<compile_context>
chip_gen: v7x
topology: tpu7x:2x2x1
jax: 0.10.0
libtpu: 0.0.40
codegen_flags: <defaults>
</compile_context>

<pallas_src>
import functools

import jax
import jax.numpy as jnp
from jax import lax
from jax.experimental import pallas as pl
from jax.experimental.pallas import tpu as pltpu


def _round_up(n: int, m: int) -> int:
    return ((n + m - 1) // m) * m


def mlp_kernel(x_ref, y_ref,
               w1x_ref, b1x_ref, w1y_ref, b1y_ref,
               w2x_ref, b2x_ref, w2y_ref, b2y_ref,
               out_ref,
               *, d_pad: int, o_pad: int):
    # dn_t: contract lhs[-1] with rhs[-1]  ->  a @ W.T without transposing W
    # dn_n: contract lhs[-1] with rhs[0]   ->  a @ W   (weight in stored layout)
    dn_t = (((1,), (1,)), ((), ()))
    dn_n = (((1,), (0,)), ((), ()))
    f32 = jnp.float32

    x = x_ref[...]            # (TB, Dp)
    y = y_ref[...]            # (TB, Dp)
    w1x = w1x_ref[...]        # (Hxp, Dp)   used both "transposed" and raw
    w1y = w1y_ref[...]        # (Hyp, Dp)

    # fc1x / fc1y + ReLU (MXU matmuls, f32 accumulation; bias kept as (1, H) slab)
    x1 = jnp.maximum(
        lax.dot_general(x, w1x, dn_t, preferred_element_type=f32) + b1x_ref[...], 0.0)
    y1 = jnp.maximum(
        lax.dot_general(y, w1y, dn_t, preferred_element_type=f32) + b1y_ref[...], 0.0)

    # tx = y1 @ W1y, ty = x1 @ W1x  (weights consumed untransposed, as torch.matmul)
    tx = lax.dot_general(y1, w1y, dn_n, preferred_element_type=f32)
    ty = lax.dot_general(x1, w1x, dn_n, preferred_element_type=f32)

    # fc2x / fc2y
    outpx = lax.dot_general(x1, w2x_ref[...], dn_t,
                            preferred_element_type=f32) + b2x_ref[...]
    outpy = lax.dot_general(y1, w2y_ref[...], dn_t,
                            preferred_element_type=f32) + b2y_ref[...]

    # Single lane-dense writeback slab: [ tx | ty | outpx | outpy ], every segment
    # 128-lane aligned -> unmasked full vector stores.
    out_ref[:, 0:d_pad] = tx
    out_ref[:, d_pad:2 * d_pad] = ty
    out_ref[:, 2 * d_pad:2 * d_pad + o_pad] = outpx
    out_ref[:, 2 * d_pad + o_pad:2 * d_pad + 2 * o_pad] = outpy


def mlp_forward(x, y, params, *, tile_b: int = 256, interpret: bool = False):
    """Fused MLP forward. Returns (tx, ty, x, y, outpx, outpy) matching PyTorch."""
    w1x, b1x, w1y, b1y, w2x, b2x, w2y, b2y = params
    B, D = x.shape
    Hx = w1x.shape[0]
    Hy = w1y.shape[0]
    O = w2x.shape[0]

    LANE, SUB = 128, 8
    Dp = _round_up(D, LANE)
    Hxp = _round_up(Hx, LANE)
    Hyp = _round_up(Hy, LANE)
    Op = _round_up(O, LANE)
    TB = min(tile_b, _round_up(B, SUB))
    Bp = _round_up(B, TB)
    out_w = 2 * Dp + 2 * Op
    f32 = jnp.float32

    def pad2(a, r, c):
        a = a.astype(f32)
        return jnp.pad(a, ((0, r - a.shape[0]), (0, c - a.shape[1])))

    x_p = pad2(x, Bp, Dp)
    y_p = pad2(y, Bp, Dp)
    w1x_p = pad2(w1x, Hxp, Dp)
    w1y_p = pad2(w1y, Hyp, Dp)
    w2x_p = pad2(w2x, Op, Hxp)
    w2y_p = pad2(w2y, Op, Hyp)
    b1x_p = pad2(b1x.reshape(1, Hx), 1, Hxp)
    b1y_p = pad2(b1y.reshape(1, Hy), 1, Hyp)
    b2x_p = pad2(b2x.reshape(1, O), 1, Op)
    b2y_p = pad2(b2y.reshape(1, O), 1, Op)

    grid = (Bp // TB,)

    # Activation / output tiles move with the batch grid; weights & biases are
    # VMEM-resident (constant index_map).
    def act_spec(w):
        return pl.BlockSpec((TB, w), lambda i: (i, 0))

    def fix_spec(r, c):
        return pl.BlockSpec((r, c), lambda i: (0, 0))

    flops = 2 * Bp * (Dp * Hxp + Dp * Hyp        # fc1x, fc1y
                      + Hxp * Dp + Hyp * Dp      # ty, tx
                      + Hxp * Op + Hyp * Op)     # fc2x, fc2y
    bytes_accessed = 4 * (x_p.size + y_p.size
                          + w1x_p.size + w1y_p.size + w2x_p.size + w2y_p.size
                          + b1x_p.size + b1y_p.size + b2x_p.size + b2y_p.size
                          + Bp * out_w)

    # VMEM budget: double-buffered activation/output tiles + resident weights,
    # with headroom for intermediates; clamped so it is always legal on v7x (64 MiB).
    vmem_needed = 4 * (2 * 2 * TB * Dp          # x, y tiles (double-buffered)
                       + 2 * TB * out_w         # output slab (double-buffered)
                       + Hxp * Dp + Hyp * Dp + Op * Hxp + Op * Hyp
                       + Hxp + Hyp + 2 * Op)
    vmem_limit = int(min(48 * 1024 * 1024, max(8 * vmem_needed, 16 * 1024 * 1024)))

    kernel = functools.partial(mlp_kernel, d_pad=Dp, o_pad=Op)

    out = pl.pallas_call(
        kernel,
        out_shape=jax.ShapeDtypeStruct((Bp, out_w), f32),
        grid=grid,
        in_specs=[
            act_spec(Dp), act_spec(Dp),
            fix_spec(Hxp, Dp), fix_spec(1, Hxp),
            fix_spec(Hyp, Dp), fix_spec(1, Hyp),
            fix_spec(Op, Hxp), fix_spec(1, Op),
            fix_spec(Op, Hyp), fix_spec(1, Op),
        ],
        out_specs=pl.BlockSpec((TB, out_w), lambda i: (i, 0)),
        compiler_params=pltpu.CompilerParams(
            dimension_semantics=("parallel",),
            vmem_limit_bytes=vmem_limit),
        cost_estimate=pl.CostEstimate(flops=flops, transcendentals=0,
                                      bytes_accessed=bytes_accessed),
        interpret=interpret,
    )(x_p, y_p,
      w1x_p, b1x_p, w1y_p, b1y_p,
      w2x_p, b2x_p, w2y_p, b2y_p)

    tx = out[:B, 0:D]
    ty = out[:B, Dp:Dp + D]
    outpx = out[:B, 2 * Dp:2 * Dp + O]
    outpy = out[:B, 2 * Dp + Op:2 * Dp + Op + O]
    # x and y are returned unchanged by the PyTorch module.
    return tx, ty, x, y, outpx, outpy


def init_params(key, input_size, hidden_sizex, hidden_sizey, output_size):
    """Deterministic init mimicking nn.Linear's U(-1/sqrt(fan_in), 1/sqrt(fan_in))."""
    keys = jax.random.split(key, 8)

    def linear(kw, kb, fan_out, fan_in):
        bound = 1.0 / jnp.sqrt(jnp.float32(fan_in))
        w = jax.random.uniform(kw, (fan_out, fan_in), jnp.float32, -bound, bound)
        b = jax.random.uniform(kb, (fan_out,), jnp.float32, -bound, bound)
        return w, b

    w1x, b1x = linear(keys[0], keys[1], hidden_sizex, input_size)
    w1y, b1y = linear(keys[2], keys[3], hidden_sizey, input_size)
    w2x, b2x = linear(keys[4], keys[5], output_size, hidden_sizex)
    w2y, b2y = linear(keys[6], keys[7], output_size, hidden_sizey)
    return (w1x, b1x, w1y, b1y, w2x, b2x, w2y, b2y)


def reference_forward(x, y, params):
    """Plain-JAX reference matching the PyTorch forward exactly."""
    w1x, b1x, w1y, b1y, w2x, b2x, w2y, b2y = params
    x1 = jax.nn.relu(x @ w1x.T + b1x)
    y1 = jax.nn.relu(y @ w1y.T + b1y)
    tx = y1 @ w1y
    ty = x1 @ w1x
    outpx = x1 @ w2x.T + b2x
    outpy = y1 @ w2y.T + b2y
    return tx, ty, x, y, outpx, outpy


if __name__ == "__main__":
    # Small shapes consistent with the module's forward.
    batch = 8
    input_size = 16
    hidden_sizex = 32
    hidden_sizey = 24
    output_size = 8
    pert_ep = 0.1  # unused in forward

    key = jax.random.PRNGKey(0)
    kx, ky, kp = jax.random.split(key, 3)
    x = jax.random.normal(kx, (batch, input_size), jnp.float32)
    y = jax.random.normal(ky, (batch, input_size), jnp.float32)
    params = init_params(kp, input_size, hidden_sizex, hidden_sizey, output_size)

    outs = mlp_forward(x, y, params)
    outs = jax.block_until_ready(outs)

    refs = reference_forward(x, y, params)
    for o, r in zip(outs, refs):
        assert o.shape == r.shape and o.dtype == r.dtype
        assert jnp.allclose(o, r, atol=1e-4, rtol=1e-4), "mismatch vs reference"

    print("KERNEL_OK")
</pallas_src>

<mosaic_0001>
module attributes {stable_mosaic.version = 11 : i64} {
  func.func @mlp_kernel(%arg0: i32, %arg1: memref<8x128xf32, #tpu.memory_space<vmem>>, %arg2: memref<8x128xf32, #tpu.memory_space<vmem>>, %arg3: memref<128x128xf32, #tpu.memory_space<vmem>>, %arg4: memref<1x128xf32, #tpu.memory_space<vmem>>, %arg5: memref<128x128xf32, #tpu.memory_space<vmem>>, %arg6: memref<1x128xf32, #tpu.memory_space<vmem>>, %arg7: memref<128x128xf32, #tpu.memory_space<vmem>>, %arg8: memref<1x128xf32, #tpu.memory_space<vmem>>, %arg9: memref<128x128xf32, #tpu.memory_space<vmem>>, %arg10: memref<1x128xf32, #tpu.memory_space<vmem>>, %arg11: memref<8x512xf32, #tpu.memory_space<vmem>>) attributes {dimension_semantics = [#tpu.dimension_semantics<parallel>], iteration_bounds = array<i64: 1>, scalar_prefetch = 0 : i64, scratch_operands = 0 : i64, tpu.core_type = #tpu.core_type<tc>, window_params = [{transform_indices = @transform_0, window_bounds = array<i64: 8, 128>}, {transform_indices = @transform_1, window_bounds = array<i64: 8, 128>}, {pipeline_mode = #tpu.pipeline_mode<synchronous>, transform_indices = @transform_2, window_bounds = array<i64: 128, 128>}, {pipeline_mode = #tpu.pipeline_mode<synchronous>, transform_indices = @transform_3, window_bounds = array<i64: 1, 128>}, {pipeline_mode = #tpu.pipeline_mode<synchronous>, transform_indices = @transform_4, window_bounds = array<i64: 128, 128>}, {pipeline_mode = #tpu.pipeline_mode<synchronous>, transform_indices = @transform_5, window_bounds = array<i64: 1, 128>}, {pipeline_mode = #tpu.pipeline_mode<synchronous>, transform_indices = @transform_6, window_bounds = array<i64: 128, 128>}, {pipeline_mode = #tpu.pipeline_mode<synchronous>, transform_indices = @transform_7, window_bounds = array<i64: 1, 128>}, {pipeline_mode = #tpu.pipeline_mode<synchronous>, transform_indices = @transform_8, window_bounds = array<i64: 128, 128>}, {pipeline_mode = #tpu.pipeline_mode<synchronous>, transform_indices = @transform_9, window_bounds = array<i64: 1, 128>}, {transform_indices = @transform_10, window_bounds = array<i64: 8, 512>}]} {
    %c0 = arith.constant 0 : index
    %c0_0 = arith.constant 0 : index
    %0 = vector.load %arg1[%c0, %c0_0] : memref<8x128xf32, #tpu.memory_space<vmem>>, vector<8x128xf32>
    %c0_1 = arith.constant 0 : index
    %c0_2 = arith.constant 0 : index
    %1 = vector.load %arg2[%c0_1, %c0_2] : memref<8x128xf32, #tpu.memory_space<vmem>>, vector<8x128xf32>
    %c0_3 = arith.constant 0 : index
    %c0_4 = arith.constant 0 : index
    %2 = vector.load %arg3[%c0_3, %c0_4] : memref<128x128xf32, #tpu.memory_space<vmem>>, vector<128x128xf32>
    %c0_5 = arith.constant 0 : index
    %c0_6 = arith.constant 0 : index
    %3 = vector.load %arg5[%c0_5, %c0_6] : memref<128x128xf32, #tpu.memory_space<vmem>>, vector<128x128xf32>
    %cst = arith.constant dense<0.000000e+00> : vector<8x128xf32>
    %4 = tpu.matmul %0, %2, %cst {dimension_numbers = #tpu.dot_dimension_numbers<[1], [1], [0], [0], [0, 0, 1, 0], [], []>} : vector<8x128xf32>, vector<128x128xf32>, vector<8x128xf32> -> vector<8x128xf32>
    %c0_7 = arith.constant 0 : index
    %c0_8 = arith.constant 0 : index
    %5 = vector.load %arg4[%c0_7, %c0_8] : memref<1x128xf32, #tpu.memory_space<vmem>>, vector<1x128xf32>
    %6 = vector.broadcast %5 : vector<1x128xf32> to vector<8x128xf32>
    %7 = arith.addf %4, %6 : vector<8x128xf32>
    %cst_9 = arith.constant 0.000000e+00 : f32
    %8 = vector.broadcast %cst_9 : f32 to vector<8x128xf32>
    %9 = arith.maximumf %7, %8 : vector<8x128xf32>
    %cst_10 = arith.constant dense<0.000000e+00> : vector<8x128xf32>
    %10 = tpu.matmul %1, %3, %cst_10 {dimension_numbers = #tpu.dot_dimension_numbers<[1], [1], [0], [0], [0, 0, 1, 0], [], []>} : vector<8x128xf32>, vector<128x128xf32>, vector<8x128xf32> -> vector<8x128xf32>
    %c0_11 = arith.constant 0 : index
    %c0_12 = arith.constant 0 : index
    %11 = vector.load %arg6[%c0_11, %c0_12] : memref<1x128xf32, #tpu.memory_space<vmem>>, vector<1x128xf32>
    %12 = vector.broadcast %11 : vector<1x128xf32> to vector<8x128xf32>
    %13 = arith.addf %10, %12 : vector<8x128xf32>
    %cst_13 = arith.constant 0.000000e+00 : f32
    %14 = vector.broadcast %cst_13 : f32 to vector<8x128xf32>
    %15 = arith.maximumf %13, %14 : vector<8x128xf32>
    %cst_14 = arith.constant dense<0.000000e+00> : vector<8x128xf32>
    %16 = tpu.matmul %15, %3, %cst_14 {dimension_numbers = #tpu.dot_dimension_numbers<[1], [0], [0], [1], [0, 0, 1, 1], [], []>} : vector<8x128xf32>, vector<128x128xf32>, vector<8x128xf32> -> vector<8x128xf32>
    %cst_15 = arith.constant dense<0.000000e+00> : vector<8x128xf32>
    %17 = tpu.matmul %9, %2, %cst_15 {dimension_numbers = #tpu.dot_dimension_numbers<[1], [0], [0], [1], [0, 0, 1, 1], [], []>} : vector<8x128xf32>, vector<128x128xf32>, vector<8x128xf32> -> vector<8x128xf32>
    %c0_16 = arith.constant 0 : index
    %c0_17 = arith.constant 0 : index
    %18 = vector.load %arg7[%c0_16, %c0_17] : memref<128x128xf32, #tpu.memory_space<vmem>>, vector<128x128xf32>
    %cst_18 = arith.constant dense<0.000000e+00> : vector<8x128xf32>
    %19 = tpu.matmul %9, %18, %cst_18 {dimension_numbers = #tpu.dot_dimension_numbers<[1], [1], [0], [0], [0, 0, 1, 0], [], []>} : vector<8x128xf32>, vector<128x128xf32>, vector<8x128xf32> -> vector<8x128xf32>
    %c0_19 = arith.constant 0 : index
    %c0_20 = arith.constant 0 : index
    %20 = vector.load %arg8[%c0_19, %c0_20] : memref<1x128xf32, #tpu.memory_space<vmem>>, vector<1x128xf32>
    %21 = vector.broadcast %20 : vector<1x128xf32> to vector<8x128xf32>
    %22 = arith.addf %19, %21 : vector<8x128xf32>
    %c0_21 = arith.constant 0 : index
    %c0_22 = arith.constant 0 : index
    %23 = vector.load %arg9[%c0_21, %c0_22] : memref<128x128xf32, #tpu.memory_space<vmem>>, vector<128x128xf32>
    %cst_23 = arith.constant dense<0.000000e+00> : vector<8x128xf32>
    %24 = tpu.matmul %15, %23, %cst_23 {dimension_numbers = #tpu.dot_dimension_numbers<[1], [1], [0], [0], [0, 0, 1, 0], [], []>} : vector<8x128xf32>, vector<128x128xf32>, vector<8x128xf32> -> vector<8x128xf32>
    %c0_24 = arith.constant 0 : index
    %c0_25 = arith.constant 0 : index
    %25 = vector.load %arg10[%c0_24, %c0_25] : memref<1x128xf32, #tpu.memory_space<vmem>>, vector<1x128xf32>
    %26 = vector.broadcast %25 : vector<1x128xf32> to vector<8x128xf32>
    %27 = arith.addf %24, %26 : vector<8x128xf32>
    %c0_26 = arith.constant 0 : index
    %c0_27 = arith.constant 0 : index
    %28 = vector.load %arg11[%c0_26, %c0_27] : memref<8x512xf32, #tpu.memory_space<vmem>>, vector<8x128xf32>
    tpu.vector_store %arg11[%c0_26, %c0_27], %16 {strides = array<i32>} : memref<8x512xf32, #tpu.memory_space<vmem>>, vector<8x128xf32>,
    %c0_28 = arith.constant 0 : index
    %c128 = arith.constant 128 : index
    %29 = vector.load %arg11[%c0_28, %c128] : memref<8x512xf32, #tpu.memory_space<vmem>>, vector<8x128xf32>
    tpu.vector_store %arg11[%c0_28, %c128], %17 {strides = array<i32>} : memref<8x512xf32, #tpu.memory_space<vmem>>, vector<8x128xf32>,
    %c0_29 = arith.constant 0 : index
    %c256 = arith.constant 256 : index
    %30 = vector.load %arg11[%c0_29, %c256] : memref<8x512xf32, #tpu.memory_space<vmem>>, vector<8x128xf32>
    tpu.vector_store %arg11[%c0_29, %c256], %22 {strides = array<i32>} : memref<8x512xf32, #tpu.memory_space<vmem>>, vector<8x128xf32>,
    %c0_30 = arith.constant 0 : index
    %c384 = arith.constant 384 : index
    %31 = vector.load %arg11[%c0_30, %c384] : memref<8x512xf32, #tpu.memory_space<vmem>>, vector<8x128xf32>
    tpu.vector_store %arg11[%c0_30, %c384], %27 {strides = array<i32>} : memref<8x512xf32, #tpu.memory_space<vmem>>, vector<8x128xf32>,
    return
  }
  func.func @transform_0(%arg0: i32) -> (i32, i32) {
    %c0_i32 = arith.constant 0 : i32
    %c0_i32_0 = arith.constant 0 : i32
    return %arg0, %c0_i32 : i32, i32
  }
  func.func @transform_1(%arg0: i32) -> (i32, i32) {
    %c0_i32 = arith.constant 0 : i32
    %c0_i32_0 = arith.constant 0 : i32
    return %arg0, %c0_i32 : i32, i32
  }
  func.func @transform_2(%arg0: i32) -> (i32, i32) {
    %c0_i32 = arith.constant 0 : i32
    %c0_i32_0 = arith.constant 0 : i32
    %c0_i32_1 = arith.constant 0 : i32
    return %c0_i32, %c0_i32_0 : i32, i32
  }
  func.func @transform_3(%arg0: i32) -> (i32, i32) {
    %c0_i32 = arith.constant 0 : i32
    %c0_i32_0 = arith.constant 0 : i32
    %c0_i32_1 = arith.constant 0 : i32
    return %c0_i32, %c0_i32_0 : i32, i32
  }
  func.func @transform_4(%arg0: i32) -> (i32, i32) {
    %c0_i32 = arith.constant 0 : i32
    %c0_i32_0 = arith.constant 0 : i32
    %c0_i32_1 = arith.constant 0 : i32
    return %c0_i32, %c0_i32_0 : i32, i32
  }
  func.func @transform_5(%arg0: i32) -> (i32, i32) {
    %c0_i32 = arith.constant 0 : i32
    %c0_i32_0 = arith.constant 0 : i32
    %c0_i32_1 = arith.constant 0 : i32
    return %c0_i32, %c0_i32_0 : i32, i32
  }
  func.func @transform_6(%arg0: i32) -> (i32, i32) {
    %c0_i32 = arith.constant 0 : i32
    %c0_i32_0 = arith.constant 0 : i32
    %c0_i32_1 = arith.constant 0 : i32
    return %c0_i32, %c0_i32_0 : i32, i32
  }
  func.func @transform_7(%arg0: i32) -> (i32, i32) {
    %c0_i32 = arith.constant 0 : i32
    %c0_i32_0 = arith.constant 0 : i32
    %c0_i32_1 = arith.constant 0 : i32
    return %c0_i32, %c0_i32_0 : i32, i32
  }
  func.func @transform_8(%arg0: i32) -> (i32, i32) {
    %c0_i32 = arith.constant 0 : i32
    %c0_i32_0 = arith.constant 0 : i32
    %c0_i32_1 = arith.constant 0 : i32
    return %c0_i32, %c0_i32_0 : i32, i32
  }
  func.func @transform_9(%arg0: i32) -> (i32, i32) {
    %c0_i32 = arith.constant 0 : i32
    %c0_i32_0 = arith.constant 0 : i32
    %c0_i32_1 = arith.constant 0 : i32
    return %c0_i32, %c0_i32_0 : i32, i32
  }
  func.func @transform_10(%arg0: i32) -> (i32, i32) {
    %c0_i32 = arith.constant 0 : i32
    %c0_i32_0 = arith.constant 0 : i32
    return %arg0, %c0_i32 : i32, i32
  }
}

</mosaic_0001>

<bundles_post_ra>
// kernel: tpu_custom_call.1
= control target key start
LH: loop header
LB: loop body
LE: loop exit
PB: predicated region body
PF: predicated region fallthrough
CT: control target
= control target key end

     0   :  { %15 = vsyncpa [#allocation3], 0  ;;  %s1565_s0 = inlined_call_operand.hbm [shape: f32[8,128], index: 0, kind: input, shape index: {}]   ;;  %s1566_s1 = inlined_call_operand.hbm [shape: f32[8,128], index: 1, kind: input, shape index: {}]   ;;  %s1567_s2 = inlined_call_operand.hbm [shape: f32[128,128], index: 2, kind: input, shape index: {}]   ;;  %s1568_s3 = inlined_call_operand.vmem [shape: f32[1,128], index: 3, kind: input, shape index: {}]   ;;  %s1569_s4 = inlined_call_operand.hbm [shape: f32[128,128], index: 4, kind: input, shape index: {}]   ;;  %s1570_s5 = inlined_call_operand.vmem [shape: f32[1,128], index: 5, kind: input, shape index: {}]   ;;  %s1571_s6 = inlined_call_operand.hbm [shape: f32[128,128], index: 6, kind: input, shape index: {}]   ;;  %s1572_s7 = inlined_call_operand.vmem [shape: f32[1,128], index: 7, kind: input, shape index: {}]   ;;  %s1573_s8 = inlined_call_operand.hbm [shape: f32[128,128], index: 8, kind: input, shape index: {}]   ;;  %s1574_s9 = inlined_call_operand.vmem [shape: f32[1,128], index: 9, kind: input, shape index: {}]   ;;  %s1575_s10 = inlined_call_operand.hbm [shape: f32[8,512], index: 10, kind: output, shape index: {}]  }
   0x1   :  { %16 = vsyncpa [#allocation6], 0 }
   0x2   :  { %17 = vsyncpa [#allocation9], 0 }
   0x3   :  { %18 = vsyncpa [#allocation12], 0 }
   0x4   :  { %19 = vsyncpa [#allocation4], 0  ;;  %s1288_s13 = smov [#allocation5]   ;;  %s1124_s17 = scalar_lea.hbm %s1566_s1, 128 }
   0x5   :  { %s36_s14 = sshll.u32 %s1288_s13, 4  ;;  %p1125_p0 = scmp.ne.s32.totalorder %s1566_s1, %s1124_s17  ;;  %s37_s14 = int_to_ptr.vmem [resolvable:$true] %s36_s14 }
   0x6   :  { %p1128_p1 = scmp.lt.u32.totalorder %s1124_s17, %s1566_s1 }
   0x8   :  { %p1130_p2 = pnand %p1128_p1, %p1125_p0 }
   0xa   :  { %1133 = shalt.err (!%p1130_p2)
}
   0xb   :  { %s1134_s22 = scalar_lea.vmem %s37_s14, 128  ;;  %p1139_p4 = scmp.lt.s32.totalorder %s37_s14, %s37_s14 }
   0xc   :  { %p1135_p3 = scmp.ne.s32.totalorder %s37_s14, %s1134_s22  ;;  %p1140_p5 = scmp.lt.s32.totalorder %s1134_s22, %s1134_s22 }
   0xe   :  { %p1141_p6 = por %p1140_p5, %p1139_p4 }
  0x10   :  { %p1142_p7 = pnand %p1141_p6, %p1135_p3 }
  0x12   :  { %1145 = shalt.err (!%p1142_p7)
}
  0x13   :  { %39 = dma.hbm_to_vmem [thread:$0]  %s1566_s1, 128, %s37_s14, [#allocation6]  }
  0x14   :  { %s1289_s25 = smov [#allocation8]   ;;  %s1290_s27 = smov [#allocation2]  }
  0x15   :  { %s59_s26 = sshll.u32 %s1289_s25, 4  ;;  %s26_s28 = sshll.u32 %s1290_s27, 4  ;;  %s60_s26 = int_to_ptr.vmem [resolvable:$true] %s59_s26  ;;  %s27_s28 = int_to_ptr.vmem [resolvable:$true] %s26_s28 }
  0x16   :  { %s1146_s11 = scalar_lea.hbm %s1569_s4, 2048 }
  0x17   :  { %p1147_p8 = scmp.ne.s32.totalorder %s1569_s4, %s1146_s11  ;;  %p1150_p9 = scmp.lt.u32.totalorder %s1146_s11, %s1569_s4 }
  0x19   :  { %p1152_p10 = pnand %p1150_p9, %p1147_p8 }
  0x1b   :  { %1155 = shalt.err (!%p1152_p10)
}
  0x1c   :  { %s1156_s1 = scalar_lea.vmem %s60_s26, 2048  ;;  %p1161_p12 = scmp.lt.s32.totalorder %s60_s26, %s60_s26 }
  0x1d   :  { %p1157_p11 = scmp.ne.s32.totalorder %s60_s26, %s1156_s1  ;;  %p1162_p13 = scmp.lt.s32.totalorder %s1156_s1, %s1156_s1 }
  0x1f   :  { %p1163_p0 = por %p1162_p13, %p1161_p12 }
  0x21   :  { %p1164_p1 = pnand %p1163_p0, %p1157_p11 }
  0x23   :  { %1167 = shalt.err (!%p1164_p1)
}
  0x24   :  { %s1291_s14 = smov 128   ;;  %s1292_s17 = smov 8  }
  0x25   :  { %65 = dma.hbm_to_vmem [thread:$0]  %s1569_s4, 2048, %s60_s26, [#allocation9], %s1291_s14, %s1291_s14, %s1292_s17  }
  0x26   :  { %s1168_s22 = scalar_lea.hbm %s1565_s0, 128 }
  0x27   :  { %p1169_p2 = scmp.ne.s32.totalorder %s1565_s0, %s1168_s22  ;;  %p1172_p3 = scmp.lt.u32.totalorder %s1168_s22, %s1565_s0 }
  0x29   :  { %p1174_p4 = pnand %p1172_p3, %p1169_p2 }
  0x2b   :  { %1177 = shalt.err (!%p1174_p4)
}
  0x2c   :  { %s1178_s29 = scalar_lea.vmem %s27_s28, 128  ;;  %p1183_p6 = scmp.lt.s32.totalorder %s27_s28, %s27_s28 }
  0x2d   :  { %p1179_p5 = scmp.ne.s32.totalorder %s27_s28, %s1178_s29  ;;  %p1184_p7 = scmp.lt.s32.totalorder %s1178_s29, %s1178_s29 }
  0x2f   :  { %p1185_p8 = por %p1184_p7, %p1183_p6 }
  0x31   :  { %p1186_p9 = pnand %p1185_p8, %p1179_p5 }
  0x33   :  { %1189 = shalt.err (!%p1186_p9)
}
  0x34   :  { %29 = dma.hbm_to_vmem [thread:$0]  %s1565_s0, 128, %s27_s28, [#allocation3]  }
  0x35   :  { %s1293_s30 = smov [#allocation7]   ;;  %s1294_s12 = smov [#allocation10]  }
  0x36   :  { %s45_s11 = sshll.u32 %s1293_s30, 4  ;;  %s73_s13 = sshll.u32 %s1294_s12, 4  ;;  %s46_s11 = int_to_ptr.vmem [resolvable:$true] %s45_s11  ;;  %s74_s13 = int_to_ptr.vmem [resolvable:$true] %s73_s13 }
  0x37   :  { %s1190_s1 = scalar_lea.hbm %s1567_s2, 2048 }
  0x38   :  { %p1191_p10 = scmp.ne.s32.totalorder %s1567_s2, %s1190_s1  ;;  %p1194_p11 = scmp.lt.u32.totalorder %s1190_s1, %s1567_s2 }
  0x3a   :  { %p1196_p12 = pnand %p1194_p11, %p1191_p10 }
  0x3c   :  { %1199 = shalt.err (!%p1196_p12)
}
  0x3d   :  { %s1200_s0 = scalar_lea.vmem %s46_s11, 2048  ;;  %p1205_p0 = scmp.lt.s32.totalorder %s46_s11, %s46_s11 }
  0x3e   :  { %p1201_p13 = scmp.ne.s32.totalorder %s46_s11, %s1200_s0  ;;  %p1206_p1 = scmp.lt.s32.totalorder %s1200_s0, %s1200_s0 }
  0x40   :  { %p1207_p2 = por %p1206_p1, %p1205_p0 }
  0x42   :  { %p1208_p3 = pnand %p1207_p2, %p1201_p13 }
  0x44   :  { %1211 = shalt.err (!%p1208_p3)
}
  0x45   :  { %51 = dma.hbm_to_vmem [thread:$0]  %s1567_s2, 2048, %s46_s11, [#allocation6], %s1291_s14, %s1291_s14, %s1292_s17  }
  0x46   :  { %s1212_s25 = scalar_lea.hbm %s1571_s6, 2048 }
  0x47   :  { %p1213_p4 = scmp.ne.s32.totalorder %s1571_s6, %s1212_s25  ;;  %p1216_p5 = scmp.lt.u32.totalorder %s1212_s25, %s1571_s6 }
  0x49   :  { %p1218_p6 = pnand %p1216_p5, %p1213_p4 }
  0x4b   :  { %1221 = shalt.err (!%p1218_p6)
}
  0x4c   :  { %s1222_s30 = scalar_lea.vmem %s74_s13, 2048  ;;  %p1227_p8 = scmp.lt.s32.totalorder %s74_s13, %s74_s13 }
  0x4d   :  { %p1223_p7 = scmp.ne.s32.totalorder %s74_s13, %s1222_s30  ;;  %p1228_p9 = scmp.lt.s32.totalorder %s1222_s30, %s1222_s30 }
  0x4f   :  { %p1229_p10 = por %p1228_p9, %p1227_p8 }
  0x51   :  { %p1230_p11 = pnand %p1229_p10, %p1223_p7 }
  0x53   :  { %1233 = shalt.err (!%p1230_p11)
}
  0x54   :  { %79 = dma.hbm_to_vmem [thread:$0]  %s1571_s6, 2048, %s74_s13, [#allocation9], %s1291_s14, %s1291_s14, %s1292_s17  }
  0x55   :  { %s1295_s12 = smov [#allocation11]   ;;  %s1234_s18 = scalar_lea.hbm %s1573_s8, 2048 }
  0x56   :  { %s87_s15 = sshll.u32 %s1295_s12, 4  ;;  %p1235_p12 = scmp.ne.s32.totalorder %s1573_s8, %s1234_s18  ;;  %s88_s15 = int_to_ptr.vmem [resolvable:$true] %s87_s15 }
  0x57   :  { %p1238_p13 = scmp.lt.u32.totalorder %s1234_s18, %s1573_s8 }
  0x59   :  { %p1240_p0 = pnand %p1238_p13, %p1235_p12 }
  0x5b   :  { %1243 = shalt.err (!%p1240_p0)
}
  0x5c   :  { %s1244_s28 = scalar_lea.vmem %s88_s15, 2048  ;;  %p1249_p2 = scmp.lt.s32.totalorder %s88_s15, %s88_s15 }
  0x5d   :  { %p1245_p1 = scmp.ne.s32.totalorder %s88_s15, %s1244_s28  ;;  %p1250_p3 = scmp.lt.s32.totalorder %s1244_s28, %s1244_s28 }
  0x5f   :  { %p1251_p4 = por %p1250_p3, %p1249_p2 }
  0x61   :  { %p1252_p5 = pnand %p1251_p4, %p1245_p1 }
  0x63   :  { %1255 = shalt.err (!%p1252_p5)
}
  0x64   :  { %93 = dma.hbm_to_vmem [thread:$0]  %s1573_s8, 2048, %s88_s15, [#allocation12], %s1291_s14, %s1291_s14, %s1292_s17  }
  0x65   :  { %1278 = dma.done.wait [#allocation3], 128  }
  0x66   :  { %1279 = vsyncadd [#allocation3], 4294967168 }
  0x67   :  { %1280 = dma.done.wait [#allocation6], 2176  }
  0x68   :  { %1281 = vsyncadd [#allocation6], 4294965120 }
  0x69   :  { %1282 = dma.done.wait [#allocation9], 4096  }
  0x6a   :  { %1283 = vsyncadd [#allocation9], 4294963200 }
  0x6b   :  { %1284 = dma.done.wait [#allocation12], 2048  }
  0x6c   :  { %1285 = vsyncadd [#allocation12], 4294965248  ;;  %v1296_v0 = vmov 0.0|0.0   ;;  %vm1297_vm0 = vmmov 0   ;;  %v1298_v1 = vmov 0.0   ;;  %v116_v2 = vld [vmem:[#allocation7] sm:$0xff] }
  0x6d   :  { %968 = vmatprep.subr.bf16.mxu0 %v1296_v0  ;;  %992 = vmatprep.subr.bf16.mxu1 %v1296_v0  ;;  %v117_v3 = vld [vmem:[#allocation7 + $0x8] sm:$0xff]  ;;  %v132_v4 = vld [vmem:[#allocation8] sm:$0xff]  ;;  %v118_v8 = vld [vmem:[#allocation7 + $0x10] sm:$0xff]  ;;  %s1299_s25 = smov [#allocation13]  }
  0x6e   :  { %790 = vmatprep.mubr.msk.f32.mxu0 %vm1297_vm0, %v1298_v1  ;;  %825 = vmatprep.mubr.msk.f32.mxu1 %vm1297_vm0, %v1298_v1  ;;  %v1445_v5 = vpack.c.bf16 %v117_v3, %v116_v2  ;;  %v133_v6 = vld [vmem:[#allocation8 + $0x8] sm:$0xff]  ;;  %v119_v9 = vld [vmem:[#allocation7 + $0x18] sm:$0xff]  ;;  %v134_v10 = vld [vmem:[#allocation8 + $0x10] sm:$0xff]  ;;  %s640_s27 = sshll.u32 %s1299_s25, 4  ;;  %s641_s27 = int_to_ptr.vmem [resolvable:$true] %s640_s27 }
  0x6f   :  { %v1447_v7 = vpack.c.bf16 %v133_v6, %v132_v4  ;;  %v135_v11 = vld [vmem:[#allocation8 + $0x18] sm:$0xff]  ;;  %v1453_v12 = vpack.c.bf16 %v119_v9, %v118_v8  ;;  %v120_v14 = vld [vmem:[#allocation7 + $0x20] sm:$0xff]  ;;  %v121_v15 = vld [vmem:[#allocation7 + $0x28] sm:$0xff]  ;;  %s1256_s29 = scalar_lea.vmem %s641_s27, 512  ;;  %p1261_p7 = scmp.lt.s32.totalorder %s641_s27, %s641_s27 }
  0x70   :  { %970 = vmatpush3.bf16.xpose.msra.mxu0 %v1445_v5  ;;  %v1455_v13 = vpack.c.bf16 %v135_v11, %v134_v10  ;;  %v136_v16 = vld [vmem:[#allocation8 + $0x20] sm:$0xff]  ;;  %v137_v17 = vld [vmem:[#allocation8 + $0x28] sm:$0xff]  ;;  %v1461_v18 = vpack.c.bf16 %v121_v15, %v120_v14  ;;  %v122_v20 = vld [vmem:[#allocation7 + $0x30] sm:$0xff]  ;;  %p1257_p6 = scmp.ne.s32.totalorder %s641_s27, %s1256_s29  ;;  %p1262_p8 = scmp.lt.s32.totalorder %s1256_s29, %s1256_s29 }
  0x71   :  { %994 = vmatpush3.bf16.xpose.msra.mxu1 %v1447_v7  ;;  %971 = vmatprep.subr.bf16.mxu0 %v1296_v0  ;;  %v1463_v19 = vpack.c.bf16 %v137_v17, %v136_v16  ;;  %v123_v21 = vld [vmem:[#allocation7 + $0x38] sm:$0xff]  ;;  %v138_v22 = vld [vmem:[#allocation8 + $0x30] sm:$0xff]  ;;  %v124_v26 = vld [vmem:[#allocation7 + $0x40] sm:$0xff] }
  0x72   :  { %995 = vmatprep.subr.bf16.mxu1 %v1296_v0  ;;  %v139_v23 = vld [vmem:[#allocation8 + $0x38] sm:$0xff]  ;;  %v1469_v24 = vpack.c.bf16 %v123_v21, %v122_v20  ;;  %v125_v27 = vld [vmem:[#allocation7 + $0x48] sm:$0xff]  ;;  %v140_v28 = vld [vmem:[#allocation8 + $0x40] sm:$0xff]  ;;  %p1263_p9 = por %p1262_p8, %p1261_p7 }
  0x73   :  { %v1002_v25 = vpack.c.bf16 %v139_v23, %v138_v22  ;;  %v141_v29 = vld [vmem:[#allocation8 + $0x48] sm:$0xff]  ;;  %v981_v30 = vpack.c.bf16 %v125_v27, %v124_v26  ;;  %v126_v32 = vld [vmem:[#allocation7 + $0x50] sm:$0xff]  ;;  %v127_v33 = vld [vmem:[#allocation7 + $0x58] sm:$0xff] }
  0x74   :  { %v1005_v31 = vpack.c.bf16 %v141_v29, %v140_v28  ;;  %v142_v34 = vld [vmem:[#allocation8 + $0x50] sm:$0xff]  ;;  %v143_v35 = vld [vmem:[#allocation8 + $0x58] sm:$0xff]  ;;  %v984_v36 = vpack.c.bf16 %v127_v33, %v126_v32  ;;  %v128_v38 = vld [vmem:[#allocation7 + $0x60] sm:$0xff]  ;;  %p1264_p10 = pnand %p1263_p9, %p1257_p6 }
  0x75   :  { %v1008_v37 = vpack.c.bf16 %v143_v35, %v142_v34  ;;  %v129_v39 = vld [vmem:[#allocation7 + $0x68] sm:$0xff]  ;;  %v144_v40 = vld [vmem:[#allocation8 + $0x60] sm:$0xff]  ;;  %v130_v44 = vld [vmem:[#allocation7 + $0x70] sm:$0xff] }
  0x76   :  { %v145_v41 = vld [vmem:[#allocation8 + $0x68] sm:$0xff]  ;;  %v987_v42 = vpack.c.bf16 %v129_v39, %v128_v38  ;;  %v131_v45 = vld [vmem:[#allocation7 + $0x78] sm:$0xff]  ;;  %v146_v46 = vld [vmem:[#allocation8 + $0x70] sm:$0xff] }
  0x77   :  { %v1011_v43 = vpack.c.bf16 %v145_v41, %v144_v40  ;;  %v147_v47 = vld [vmem:[#allocation8 + $0x78] sm:$0xff]  ;;  %v990_v48 = vpack.c.bf16 %v131_v45, %v130_v44  ;;  %v114_v50 = vld [vmem:[#allocation2] sm:$0xff]  ;;  %v537_v54 = vld [vmem:[#allocation11] sm:$0xff] }
  0x78   :  { %973 = vmatpush3.bf16.xpose.msra.mxu0 %v1453_v12  ;;  %v1014_v49 = vpack.c.bf16 %v147_v47, %v146_v46  ;;  %v115_v51 = vld [vmem:[#allocation5] sm:$0xff]  ;;  %v652_v52 = vld [vmem:[%s1568_s3] ss:$0 sm:$0xff]  ;;  %v538_v55 = vld [vmem:[#allocation11 + $0x8] sm:$0xff] }
  0x79   :  { %997 = vmatpush3.bf16.xpose.msra.mxu1 %v1455_v13  ;;  %974 = vmatprep.subr.bf16.mxu0 %v1296_v0  ;;  %v653_v53 = vld [vmem:[%s1570_s5] ss:$0 sm:$0xff]  ;;  %v444_v57 = vld [vmem:[#allocation10] sm:$0xff]  ;;  %v445_v58 = vld [vmem:[#allocation10 + $0x8] sm:$0xff]  ;;  %v1089_v2 = vpack.c.bf16 %v538_v55, %v537_v54 }
  0x7a   :  { %998 = vmatprep.subr.bf16.mxu1 %v1296_v0  ;;  %v1065_v4 = vpack.c.bf16 %v445_v58, %v444_v57  ;;  %v539_v6 = vld [vmem:[#allocation11 + $0x10] sm:$0xff]  ;;  %v447_v9 = vld [vmem:[#allocation10 + $0x18] sm:$0xff]  ;;  %v448_v14 = vld [vmem:[#allocation10 + $0x20] sm:$0xff] }
  0x7b   :  { %v446_v8 = vld [vmem:[#allocation10 + $0x10] sm:$0xff]  ;;  %v449_v15 = vld [vmem:[#allocation10 + $0x28] sm:$0xff]  ;;  %v451_v20 = vld [vmem:[#allocation10 + $0x38] sm:$0xff] }
  0x7c   :  { %v1068_v11 = vpack.c.bf16 %v447_v9, %v446_v8  ;;  %v1071_v17 = vpack.c.bf16 %v449_v15, %v448_v14  ;;  %v545_v23 = vld [vmem:[#allocation11 + $0x40] sm:$0xff]  ;;  %v453_v26 = vld [vmem:[#allocation10 + $0x48] sm:$0xff]  ;;  %v547_v29 = vld [vmem:[#allocation11 + $0x50] sm:$0xff] }
  0x7d   :  { %v455_v32 = vld [vmem:[#allocation10 + $0x58] sm:$0xff]  ;;  %v549_v35 = vld [vmem:[#allocation11 + $0x60] sm:$0xff]  ;;  %v457_v38 = vld [vmem:[#allocation10 + $0x68] sm:$0xff] }
  0x7e   :  { %v551_v41 = vld [vmem:[#allocation11 + $0x70] sm:$0xff]  ;;  %v459_v44 = vld [vmem:[#allocation10 + $0x78] sm:$0xff] }
  0x80   :  { %976 = vmatpush3.bf16.xpose.msra.mxu0 %v1461_v18 }
  0x81   :  { %1000 = vmatpush3.bf16.xpose.msra.mxu1 %v1463_v19  ;;  %977 = vmatprep.subr.bf16.mxu0 %v1296_v0 }
  0x82   :  { %1001 = vmatprep.subr.bf16.mxu1 %v1296_v0 }
  0x88   :  { %979 = vmatpush3.bf16.xpose.msra.mxu0 %v1469_v24 }
  0x89   :  { %1003 = vmatpush3.bf16.xpose.msra.mxu1 %v1002_v25  ;;  %980 = vmatprep.subr.bf16.mxu0 %v1296_v0 }
  0x8a   :  { %1004 = vmatprep.subr.bf16.mxu1 %v1296_v0 }
  0x90   :  { %982 = vmatpush3.bf16.xpose.msra.mxu0 %v981_v30 }
  0x91   :  { %1006 = vmatpush3.bf16.xpose.msra.mxu1 %v1005_v31  ;;  %983 = vmatprep.subr.bf16.mxu0 %v1296_v0 }
  0x92   :  { %1007 = vmatprep.subr.bf16.mxu1 %v1296_v0 }
  0x98   :  { %985 = vmatpush3.bf16.xpose.msra.mxu0 %v984_v36 }
  0x99   :  { %1009 = vmatpush3.bf16.xpose.msra.mxu1 %v1008_v37  ;;  %986 = vmatprep.subr.bf16.mxu0 %v1296_v0 }
  0x9a   :  { %1010 = vmatprep.subr.bf16.mxu1 %v1296_v0 }
  0xa0   :  { %988 = vmatpush3.bf16.xpose.msra.mxu0 %v987_v42 }
  0xa1   :  { %1012 = vmatpush3.bf16.xpose.msra.mxu1 %v1011_v43  ;;  %989 = vmatprep.subr.bf16.mxu0 %v1296_v0 }
  0xa2   :  { %1013 = vmatprep.subr.bf16.mxu1 %v1296_v0 }
  0xa8   :  { %991 = vmatpush3.bf16.xpose.msra.mxu0 %v990_v48 }
  0xa9   :  { %1015 = vmatpush3.bf16.xpose.msra.mxu1 %v1014_v49  ;;  %1016 = vmatprep.subr.bf16.mxu0 %v1296_v0 }
  0xaa   :  { %1040 = vmatprep.subr.bf16.mxu1 %v1296_v0 }
  0xaf   :  { %791 = vmatmul.mubr.f32.vlgmr.msra.gmra.mrb[0].mxu0 %v114_v50 }
  0xb0   :  { %826 = vmatmul.mubr.f32.vlgmr.msra.gmra.mrb[0].mxu1 %v115_v51  ;;  %1018 = vmatpush3.bf16.msra.mxu0 %v1447_v7  ;;  %v540_v7 = vld [vmem:[#allocation11 + $0x18] sm:$0xff]  ;;  %v654_v51 = vld [vmem:[%s1572_s7] ss:$0 sm:$0xff] }
  0xb1   :  { %1042 = vmatpush3.bf16.msra.mxu1 %v1445_v5  ;;  %1019 = vmatprep.subr.bf16.mxu0 %v1296_v0  ;;  %v1092_v10 = vpack.c.bf16 %v540_v7, %v539_v6 }
  0xb2   :  { %1043 = vmatprep.subr.bf16.mxu1 %v1296_v0  ;;  %860 = vmatprep.mubr.msk.f32.mxu0 %vm1297_vm0, %v1298_v1 }
  0xb3   :  { %895 = vmatprep.mubr.msk.f32.mxu1 %vm1297_vm0, %v1298_v1 }
  0xb4   :  { %1021 = vmatpush3.bf16.msra.mxu0 %v1455_v13  ;;  %v542_v13 = vld [vmem:[#allocation11 + $0x28] sm:$0xff] }
  0xb5   :  { %1045 = vmatpush3.bf16.msra.mxu1 %v1453_v12  ;;  %1022 = vmatprep.subr.bf16.mxu0 %v1296_v0  ;;  %v541_v12 = vld [vmem:[#allocation11 + $0x20] sm:$0xff] }
  0xb6   :  { %1046 = vmatprep.subr.bf16.mxu1 %v1296_v0  ;;  %v1095_v16 = vpack.c.bf16 %v542_v13, %v541_v12 }
  0xb8   :  { %1024 = vmatpush3.bf16.msra.mxu0 %v1463_v19  ;;  %v450_v19 = vld [vmem:[#allocation10 + $0x30] sm:$0xff] }
  0xb9   :  { %1048 = vmatpush3.bf16.msra.mxu1 %v1461_v18  ;;  %1025 = vmatprep.subr.bf16.mxu0 %v1296_v0  ;;  %v543_v18 = vld [vmem:[#allocation11 + $0x30] sm:$0xff]  ;;  %v1074_v22 = vpack.c.bf16 %v451_v20, %v450_v19 }
  0xba   :  { %1049 = vmatprep.subr.bf16.mxu1 %v1296_v0 }
  0xbc   :  { %1027 = vmatpush3.bf16.msra.mxu0 %v1002_v25  ;;  %v452_v25 = vld [vmem:[#allocation10 + $0x40] sm:$0xff] }
  0xbd   :  { %1051 = vmatpush3.bf16.msra.mxu1 %v1469_v24  ;;  %1028 = vmatprep.subr.bf16.mxu0 %v1296_v0  ;;  %v546_v24 = vld [vmem:[#allocation11 + $0x48] sm:$0xff]  ;;  %v1077_v28 = vpack.c.bf16 %v453_v26, %v452_v25 }
  0xbe   :  { %1052 = vmatprep.subr.bf16.mxu1 %v1296_v0  ;;  %v1101_v27 = vpack.c.bf16 %v546_v24, %v545_v23 }
  0xc0   :  { %1030 = vmatpush3.bf16.msra.mxu0 %v1005_v31  ;;  %v454_v31 = vld [vmem:[#allocation10 + $0x50] sm:$0xff] }
  0xc1   :  { %1054 = vmatpush3.bf16.msra.mxu1 %v981_v30  ;;  %1031 = vmatprep.subr.bf16.mxu0 %v1296_v0  ;;  %v548_v30 = vld [vmem:[#allocation11 + $0x58] sm:$0xff]  ;;  %v1080_v34 = vpack.c.bf16 %v455_v32, %v454_v31 }
  0xc2   :  { %1055 = vmatprep.subr.bf16.mxu1 %v1296_v0  ;;  %v1104_v33 = vpack.c.bf16 %v548_v30, %v547_v29 }
  0xc4   :  { %1033 = vmatpush3.bf16.msra.mxu0 %v1008_v37  ;;  %v456_v37 = vld [vmem:[#allocation10 + $0x60] sm:$0xff] }
  0xc5   :  { %1057 = vmatpush3.bf16.msra.mxu1 %v984_v36  ;;  %1034 = vmatprep.subr.bf16.mxu0 %v1296_v0  ;;  %v550_v36 = vld [vmem:[#allocation11 + $0x68] sm:$0xff]  ;;  %v1083_v40 = vpack.c.bf16 %v457_v38, %v456_v37 }
  0xc6   :  { %1058 = vmatprep.subr.bf16.mxu1 %v1296_v0  ;;  %v1107_v39 = vpack.c.bf16 %v550_v36, %v549_v35 }
  0xc8   :  { %1036 = vmatpush3.bf16.msra.mxu0 %v1011_v43  ;;  %v458_v43 = vld [vmem:[#allocation10 + $0x70] sm:$0xff] }
  0xc9   :  { %1060 = vmatpush3.bf16.msra.mxu1 %v987_v42  ;;  %1037 = vmatprep.subr.bf16.mxu0 %v1296_v0  ;;  %v552_v42 = vld [vmem:[#allocation11 + $0x78] sm:$0xff]  ;;  %v1086_v46 = vpack.c.bf16 %v459_v44, %v458_v43 }
  0xca   :  { %1061 = vmatprep.subr.bf16.mxu1 %v1296_v0  ;;  %v1110_v45 = vpack.c.bf16 %v552_v42, %v551_v41 }
  0xcc   :  { %1039 = vmatpush3.bf16.msra.mxu0 %v1014_v49 }
  0xcd   :  { %1063 = vmatpush3.bf16.msra.mxu1 %v990_v48  ;;  %1064 = vmatprep.subr.bf16.mxu0 %v1296_v0 }
  0xce   :  { %1088 = vmatprep.subr.bf16.mxu1 %v1296_v0 }
 0x182   :  { %v221_v56 = vpop.f32.mrb[0].mxu0 }
 0x183   :  { %v1515_v59 = vadd.f32 %v652_v52, %v221_v56  ;;  %v299_v60 = vpop.f32.mrb[0].mxu1  ;;  %v792_v61 = vpop.f32.mrb[1].mxu0 }
 0x184   :  { %v1517_v62 = vadd.f32 %v653_v53, %v299_v60  ;;  %v827_v63 = vpop.f32.mrb[1].mxu1 }
 0x185   :  { %v225_v3 = vmax.f32 %v1515_v59, 0.0 }
 0x186   :  { %v303_v5 = vmax.f32 %v1517_v62, 0.0 }
 0x187   :  { %896 = vmatmul.mubr.f32.vlgmr.msra.gmra.mrb[2].mxu1 %v225_v3 }
 0x188   :  { %861 = vmatmul.mubr.f32.vlgmr.msra.gmra.mrb[2].mxu0 %v303_v5  ;;  %1090 = vmatpush3.bf16.xpose.msra.mxu1 %v1089_v2 }
 0x189   :  { %1066 = vmatpush3.bf16.xpose.msra.mxu0 %v1065_v4  ;;  %1091 = vmatprep.subr.bf16.mxu1 %v1296_v0 }
 0x18a   :  { %1067 = vmatprep.subr.bf16.mxu0 %v1296_v0  ;;  %930 = vmatprep.mubr.msk.f32.mxu0 %vm1297_vm0, %v1298_v1 }
 0x18b   :  { %965 = vmatprep.mubr.msk.f32.mxu1 %vm1297_vm0, %v1298_v1  ;;  %v544_v1 = vld [vmem:[#allocation11 + $0x38] sm:$0xff] }
 0x18c   :  { %v1098_v21 = vpack.c.bf16 %v544_v1, %v543_v18 }
 0x190   :  { %1093 = vmatpush3.bf16.xpose.msra.mxu1 %v1092_v10 }
 0x191   :  { %1069 = vmatpush3.bf16.xpose.msra.mxu0 %v1068_v11  ;;  %1094 = vmatprep.subr.bf16.mxu1 %v1296_v0 }
 0x192   :  { %1070 = vmatprep.subr.bf16.mxu0 %v1296_v0 }
 0x198   :  { %1096 = vmatpush3.bf16.xpose.msra.mxu1 %v1095_v16 }
 0x199   :  { %1072 = vmatpush3.bf16.xpose.msra.mxu0 %v1071_v17  ;;  %1097 = vmatprep.subr.bf16.mxu1 %v1296_v0 }
 0x19a   :  { %1073 = vmatprep.subr.bf16.mxu0 %v1296_v0 }
 0x1a0   :  { %1099 = vmatpush3.bf16.xpose.msra.mxu1 %v1098_v21 }
 0x1a1   :  { %1075 = vmatpush3.bf16.xpose.msra.mxu0 %v1074_v22  ;;  %1100 = vmatprep.subr.bf16.mxu1 %v1296_v0 }
 0x1a2   :  { %1076 = vmatprep.subr.bf16.mxu0 %v1296_v0 }
 0x1a8   :  { %1102 = vmatpush3.bf16.xpose.msra.mxu1 %v1101_v27 }
 0x1a9   :  { %1078 = vmatpush3.bf16.xpose.msra.mxu0 %v1077_v28  ;;  %1103 = vmatprep.subr.bf16.mxu1 %v1296_v0 }
 0x1aa   :  { %1079 = vmatprep.subr.bf16.mxu0 %v1296_v0 }
 0x1b0   :  { %1105 = vmatpush3.bf16.xpose.msra.mxu1 %v1104_v33 }
 0x1b1   :  { %1081 = vmatpush3.bf16.xpose.msra.mxu0 %v1080_v34  ;;  %1106 = vmatprep.subr.bf16.mxu1 %v1296_v0 }
 0x1b2   :  { %1082 = vmatprep.subr.bf16.mxu0 %v1296_v0 }
 0x1b8   :  { %1108 = vmatpush3.bf16.xpose.msra.mxu1 %v1107_v39 }
 0x1b9   :  { %1084 = vmatpush3.bf16.xpose.msra.mxu0 %v1083_v40  ;;  %1109 = vmatprep.subr.bf16.mxu1 %v1296_v0 }
 0x1ba   :  { %1085 = vmatprep.subr.bf16.mxu0 %v1296_v0  ;;  %v655_v0 = vld [vmem:[%s1574_s9] ss:$0 sm:$0xff] }
 0x1c0   :  { %1111 = vmatpush3.bf16.xpose.msra.mxu1 %v1110_v45 }
 0x1c1   :  { %1087 = vmatpush3.bf16.xpose.msra.mxu0 %v1086_v46 }
 0x1c7   :  { %966 = vmatmul.mubr.f32.vlgmr.msra.gmra.mrb[4].mxu1 %v303_v5 }
 0x1c8   :  { %931 = vmatmul.mubr.f32.vlgmr.msra.gmra.mrb[4].mxu0 %v225_v3 }
 0x25a   :  { %v440_v47 = vpop.f32.mrb[2].mxu1 }
 0x25b   :  { %v370_v48 = vpop.f32.mrb[2].mxu0  ;;  %631 = vst [vmem:[#allocation13 + $0x8] sm:$0xff] %v440_v47  ;;  %v897_v49 = vpop.f32.mrb[3].mxu1 }
 0x25c   :  { %630 = vst [vmem:[#allocation13] sm:$0xff] %v370_v48  ;;  %v862_v50 = vpop.f32.mrb[3].mxu0 }
 0x29a   :  { %v626_v52 = vpop.f32.mrb[4].mxu1 }
 0x29b   :  { %v533_v53 = vpop.f32.mrb[4].mxu0  ;;  %v627_v54 = vadd.f32 %v655_v0, %v626_v52  ;;  %v967_v55 = vpop.f32.mrb[5].mxu1 }
 0x29c   :  { %v534_v56 = vadd.f32 %v654_v51, %v533_v53  ;;  %v932_v57 = vpop.f32.mrb[5].mxu0 }
 0x29d   :  { %633 = vst [vmem:[#allocation13 + $0x18] sm:$0xff] %v627_v54 }
 0x29e   :  { %632 = vst [vmem:[#allocation13 + $0x10] sm:$0xff] %v534_v56 }
 0x29f   :  { %1267 = shalt.err (!%p1264_p10)
}
 0x2a0   :  { %s1268_s4 = scalar_lea.hbm %s1575_s10, 512 }
 0x2a1   :  { %p1269_p11 = scmp.ne.s32.totalorder %s1575_s10, %s1268_s4  ;;  %p1272_p12 = scmp.lt.u32.totalorder %s1268_s4, %s1575_s10 }
 0x2a3   :  { %p1274_p13 = pnand %p1272_p12, %p1269_p11 }
 0x2a5   :  { %1277 = shalt.err (!%p1274_p13)
}
 0x2a6   :  { %643 = dma.vmem_to_hbm [thread:$0]  %s641_s27, 512, %s1575_s10, [#allocation4]  }
 0x2a7   :  { %1286 = dma.done.wait [#allocation4], 512  }
 0x2a8   :  { %1287 = vsyncadd [#allocation4], 4294966784 }
 0x2a9   :  { %647 = vsyncpa [#allocation3], 1 }
 0x2aa   :  { %648 = vsyncpa [#allocation6], 1 }
 0x2ab   :  { %649 = vsyncpa [#allocation9], 1 }
 0x2ac   :  { %650 = vsyncpa [#allocation12], 1 }
 0x2ad   :  { %651 = vsyncpa [#allocation4], 1 }

</bundles_post_ra>
